<compile_context>
chip_gen: v5e
topology: v5e:2x2
jax: 0.10.0
libtpu: 0.0.40
codegen_flags: <defaults>
</compile_context>

<pallas_src>
import jax
import jax.numpy as jnp
from jax.experimental import pallas as pl
from jax.experimental.pallas import tpu as pltpu


_LANES = 128  # map the flattened element axis onto full 128-lane vregs


def _l1_sum_kernel(a_ref, b_ref, o_ref, acc_ref):
    """Accumulate sum(|a - b|) over the M-tile grid; store scalar at the end."""
    i = pl.program_id(0)

    @pl.when(i == 0)
    def _():
        acc_ref[0] = jnp.float32(0.0)

    diff = a_ref[...] - b_ref[...]
    acc_ref[0] += jnp.sum(jnp.abs(diff))

    @pl.when(i == pl.num_programs(0) - 1)
    def _():
        o_ref[0, 0] = acc_ref[0]


def l1_loss_mean(a, b, *, tm=512):
    """mean(|a - b|), matching torch.nn.functional.l1_loss(reduction='mean')."""
    assert a.shape == b.shape, (a.shape, b.shape)
    n_elem = a.size

    a_flat = a.reshape(-1).astype(jnp.float32)
    b_flat = b.reshape(-1).astype(jnp.float32)

    # Lane-dense 2-D view: (rows, 128). Tile height: multiple of 8 sublanes,
    # capped at `tm` (512 rows * 128 lanes * 4 B * 2 inputs * 2 buffers ~ 2 MiB,
    # comfortably inside VMEM on every generation).
    rows = -(-n_elem // _LANES)
    tile_m = min(tm, ((rows + 7) // 8) * 8)
    rows_padded = ((rows + tile_m - 1) // tile_m) * tile_m
    pad = rows_padded * _LANES - n_elem
    if pad:
        # Both arrays get identical zero padding; |0 - 0| adds nothing.
        a_flat = jnp.pad(a_flat, (0, pad))
        b_flat = jnp.pad(b_flat, (0, pad))
    a2 = a_flat.reshape(rows_padded, _LANES)
    b2 = b_flat.reshape(rows_padded, _LANES)

    grid = (rows_padded // tile_m,)
    total = pl.pallas_call(
        _l1_sum_kernel,
        out_shape=jax.ShapeDtypeStruct((1, 1), jnp.float32),
        grid=grid,
        in_specs=[pl.BlockSpec((tile_m, _LANES), lambda i: (i, 0)),
                  pl.BlockSpec((tile_m, _LANES), lambda i: (i, 0))],
        out_specs=pl.BlockSpec((1, 1), lambda i: (0, 0),
                               memory_space=pltpu.MemorySpace.SMEM),
        scratch_shapes=[pltpu.SMEM((1,), jnp.float32)],
        compiler_params=pltpu.CompilerParams(
            dimension_semantics=("arbitrary",),          # sequential reduction
            vmem_limit_bytes=48 * 1024 * 1024),          # feasible on v7x (64 MiB)
    )(a2, b2)
    return total[0, 0] / jnp.float32(n_elem)


def l1_forward(gt, inp, output):
    """Mirrors L1.forward(gt, input, output): F.l1_loss(gt, output)."""
    del inp  # unused in the PyTorch reference as well
    return l1_loss_mean(gt, output)


if __name__ == "__main__":
    key = jax.random.PRNGKey(0)
    k_gt, k_in, k_out = jax.random.split(key, 3)

    B, C, H, W = 2, 4, 16, 16  # NCHW, like the PyTorch module expects
    gt = jax.random.uniform(k_gt, (B, C, H, W), jnp.float32)
    inp = jax.random.uniform(k_in, (B, C, H, W), jnp.float32)
    output = jax.random.uniform(k_out, (B, C, H, W), jnp.float32)

    loss_fn = jax.jit(l1_forward)
    loss = jax.block_until_ready(loss_fn(gt, inp, output))

    ref = jnp.mean(jnp.abs(gt - output))
    assert loss.shape == () and jnp.isfinite(loss)
    assert jnp.allclose(loss, ref, rtol=1e-5, atol=1e-6), (loss, ref)

    # Exercise the multi-tile accumulator path (grid > 1) with a tiny tile.
    loss_tiled = jax.block_until_ready(l1_loss_mean(gt, output, tm=8))
    assert jnp.allclose(loss_tiled, ref, rtol=1e-5, atol=1e-6), (loss_tiled, ref)

    print("KERNEL_OK")
</pallas_src>

<mosaic_0001>
module attributes {stable_mosaic.version = 11 : i64} {
  func.func @_l1_sum_kernel(%arg0: i32, %arg1: memref<16x128xf32, #tpu.memory_space<vmem>>, %arg2: memref<16x128xf32, #tpu.memory_space<vmem>>, %arg3: memref<1x1xf32, #tpu.memory_space<smem>>, %arg4: memref<1xf32, #tpu.memory_space<smem>>) attributes {dimension_semantics = [#tpu.dimension_semantics<arbitrary>], iteration_bounds = array<i64: 1>, scalar_prefetch = 0 : i64, scratch_operands = 1 : i64, tpu.core_type = #tpu.core_type<tc>, window_params = [{transform_indices = @transform_0, window_bounds = array<i64: 16, 128>}, {transform_indices = @transform_1, window_bounds = array<i64: 16, 128>}, {transform_indices = @transform_2, window_bounds = array<i64: 1, 1>}]} {
    %c0_i32 = arith.constant 0 : i32
    %0 = arith.cmpi eq, %arg0, %c0_i32 : i32
    %1 = arith.extui %0 : i1 to i32
    %c0_i32_0 = arith.constant 0 : i32
    %2 = arith.cmpi ne, %1, %c0_i32_0 : i32
    scf.if %2 {
      %cst_8 = arith.constant 0.000000e+00 : f32
      %c0_9 = arith.constant 0 : index
      %17 = memref.load %arg4[%c0_9] : memref<1xf32, #tpu.memory_space<smem>>
      memref.store %cst_8, %arg4[%c0_9] : memref<1xf32, #tpu.memory_space<smem>>
    } else {
    }
    %c0 = arith.constant 0 : index
    %c0_1 = arith.constant 0 : index
    %3 = vector.load %arg1[%c0, %c0_1] : memref<16x128xf32, #tpu.memory_space<vmem>>, vector<16x128xf32>
    %c0_2 = arith.constant 0 : index
    %c0_3 = arith.constant 0 : index
    %4 = vector.load %arg2[%c0_2, %c0_3] : memref<16x128xf32, #tpu.memory_space<vmem>>, vector<16x128xf32>
    %5 = arith.subf %3, %4 : vector<16x128xf32>
    %c0_4 = arith.constant 0 : index
    %6 = memref.load %arg4[%c0_4] : memref<1xf32, #tpu.memory_space<smem>>
    %7 = math.absf %5 : vector<16x128xf32>
    %8 = vector.shape_cast %7 : vector<16x128xf32> to vector<1x16x128xf32>
    %cst = arith.constant dense<0.000000e+00> : vector<1xf32>
    %9 = vector.multi_reduction <add>, %8, %cst [1, 2] : vector<1x16x128xf32> to vector<1xf32>
    %10 = vector.shape_cast %9 : vector<1xf32> to vector<1x1x1xf32>
    %11 = vector.extract %10[0, 0, 0] : f32 from vector<1x1x1xf32>
    %12 = arith.addf %6, %11 : f32
    %c0_5 = arith.constant 0 : index
    %13 = memref.load %arg4[%c0_5] : memref<1xf32, #tpu.memory_space<smem>>
    memref.store %12, %arg4[%c0_5] : memref<1xf32, #tpu.memory_space<smem>>
    %c0_i32_6 = arith.constant 0 : i32
    %14 = arith.cmpi eq, %arg0, %c0_i32_6 : i32
    %15 = arith.extui %14 : i1 to i32
    %c0_i32_7 = arith.constant 0 : i32
    %16 = arith.cmpi ne, %15, %c0_i32_7 : i32
    scf.if %16 {
      %c0_8 = arith.constant 0 : index
      %17 = memref.load %arg4[%c0_8] : memref<1xf32, #tpu.memory_space<smem>>
      %c0_9 = arith.constant 0 : index
      %c0_10 = arith.constant 0 : index
      %18 = memref.load %arg3[%c0_9, %c0_10] : memref<1x1xf32, #tpu.memory_space<smem>>
      memref.store %17, %arg3[%c0_9, %c0_10] : memref<1x1xf32, #tpu.memory_space<smem>>
    } else {
    }
    return
  }
  func.func @transform_0(%arg0: i32) -> (i32, i32) {
    %c0_i32 = arith.constant 0 : i32
    %c0_i32_0 = arith.constant 0 : i32
    return %arg0, %c0_i32 : i32, i32
  }
  func.func @transform_1(%arg0: i32) -> (i32, i32) {
    %c0_i32 = arith.constant 0 : i32
    %c0_i32_0 = arith.constant 0 : i32
    return %arg0, %c0_i32 : i32, i32
  }
  func.func @transform_2(%arg0: i32) -> (i32, i32) {
    %c0_i32 = arith.constant 0 : i32
    %c0_i32_0 = arith.constant 0 : i32
    %c0_i32_1 = arith.constant 0 : i32
    return %c0_i32, %c0_i32_0 : i32, i32
  }
}

</mosaic_0001>

<bundles_post_ra>
// kernel: l1_forward.1
= control target key start
LH: loop header
LB: loop body
LE: loop exit
PB: predicated region body
PF: predicated region fallthrough
CT: control target
= control target key end

     0   :  { %s109_s0 = inlined_call_operand.vmem [shape: f32[16,128], index: 0, kind: input, shape index: {}]   ;;  %s110_s1 = inlined_call_operand.vmem [shape: f32[16,128], index: 1, kind: input, shape index: {}]   ;;  %s111_s2 = inlined_call_operand.hbm [shape: f32[1,1], index: 2, kind: output, shape index: {}]  }
   0x1   :  { %v18_v0 = vld [vmem:[%s109_s0] sm:$0xff]  ;;  %v19_v1 = vld [vmem:[%s109_s0 + $0x8] sm:$0xff] }
   0x2   :  { %v20_v2 = vld [vmem:[%s110_s1] sm:$0xff]  ;;  %v21_v3 = vld [vmem:[%s110_s1 + $0x8] sm:$0xff] }
   0x3   :  { %v22_v4 = vsub.f32 %v18_v0, %v20_v2 }
   0x4   :  { %7 = vsyncpa [#allocation4], 0  ;;  %v23_v5 = vsub.f32 %v19_v1, %v21_v3  ;;  %s51_s18 = sshll.u32 %s111_s2, 4  ;;  %s78_s19 = smov [#allocation3]   ;;  %s52_s18 = int_to_ptr.hbm [resolvable:$true] %s51_s18 }
   0x5   :  { %v25_v6 = vand.u32 2147483647, %v22_v4 }
   0x6   :  { %v26_v7 = vand.u32 2147483647, %v23_v5 }
   0x8   :  { %v27_v8 = vadd.f32 %v26_v7, %v25_v6 }
   0xa   :  { %28 = vadd.xlane.f32.xlu0 %v27_v8 }
  0x7d   :  { %v29_v9 = vpop.xlane.xlu0 %28 }
  0x7e   :  { %v30_v10 = vrot.slane %v29_v9, 4 }
  0x80   :  { %v31_v11 = vadd.f32 %v30_v10, %v29_v9 }
  0x82   :  { %v32_v12 = vrot.slane %v31_v11, 2 }
  0x84   :  { %v33_v13 = vadd.f32 %v32_v12, %v31_v11 }
  0x86   :  { %v34_v14 = vrot.slane %v33_v13, 1 }
  0x88   :  { %v35_v15 = vadd.f32 %v34_v14, %v33_v13 }
  0x8a   :  { %61 = vpush %v35_v15 }
  0xbb   :  { %s62_s1 = spop %61 }
  0xbc   :  { %45 = sst [smem:[#allocation3]] %s62_s1 }
  0xbd   :  { %54 = dma.smem_to_hbm %s78_s19, 16, %s52_s18, [#allocation4]  }
  0xbe   :  { %76 = dma.done.wait [#allocation4], 16  }
  0xbf   :  { %77 = vsyncadd [#allocation4], 4294967280 }
  0xc0   :  { %59 = sfence }
  0xc1   :  { %60 = vsyncpa [#allocation4], 1 }

</bundles_post_ra>
